<compile_context>
chip_gen: v5e
topology: v5e:2x2
jax: 0.10.0
libtpu: 0.0.40
codegen_flags: <defaults>
</compile_context>

<pallas_src>
import jax
import jax.numpy as jnp
from jax.experimental import pallas as pl
from jax.experimental.pallas import tpu as pltpu

HYPER_KERNEL = 5   # self.hyper_kernel
HYPER_LAYER = 1    # self.hyper_layer
LN_EPS = 1e-5


def _layernorm(x, g, b, eps=LN_EPS):
    # matches torch.nn.LayerNorm (biased variance, eps inside sqrt)
    mu = jnp.mean(x, axis=-1, keepdims=True)
    xc = x - mu
    var = jnp.mean(xc * xc, axis=-1, keepdims=True)
    return xc * jax.lax.rsqrt(var + eps) * g + b


def add_transformer_kernel(
    # per-batch-element blocks -------------------------------------------------
    q_ref, k_ref, v_ref,          # (1, Lq, D), (1, S, D), (1, S, D)
    # packed parameters (broadcast over the grid) ------------------------------
    wq_ref, wk_ref, wv_ref,       # (D, D) each, pre-transposed to (in, out)
    ln_ref,                       # (6, D): lnq_g, lnq_b, lnk_g, lnk_b, lnv_g, lnv_b
    bias_ref,                     # (3, D): bq, bk, bv
    cw_ref,                       # (KH*D, C)  Conv1d folded to a matmul
    fw_ref,                       # (C, C)     pre-transposed
    cfb_ref,                      # (2, C): conv bias, fnn bias
    # output -------------------------------------------------------------------
    out_ref):                     # (1, N, D)
    Lq, D = q_ref.shape[1], q_ref.shape[2]
    N = out_ref.shape[1]
    C = fw_ref.shape[0]
    KH = cw_ref.shape[0] // D
    f32 = jnp.float32

    lnq_g, lnq_b = ln_ref[0:1, :], ln_ref[1:2, :]
    lnk_g, lnk_b = ln_ref[2:3, :], ln_ref[3:4, :]
    lnv_g, lnv_b = ln_ref[4:5, :], ln_ref[5:6, :]
    bq, bk, bv = bias_ref[0:1, :], bias_ref[1:2, :], bias_ref[2:3, :]
    cb, fb = cfb_ref[0:1, :], cfb_ref[1:2, :]

    # ---- key / value path: kcomb = relu(wk(lnk(key))) * wv(lnv(value)) -------
    kn = _layernorm(k_ref[0], lnk_g, lnk_b)                        # (S, D)
    vn = _layernorm(v_ref[0], lnv_g, lnv_b)
    kp = jnp.maximum(
        jnp.dot(kn, wk_ref[...], preferred_element_type=f32) + bk, 0.0)
    vp = jnp.dot(vn, wv_ref[...], preferred_element_type=f32) + bv
    kcomb = kp * vp                                                # (S, D)

    # ---- hoisted query path: one LN + one projection for all positions -------
    qn = _layernorm(q_ref[0], lnq_g, lnq_b)                        # (Lq, D)
    qp = jnp.dot(qn, wq_ref[...], preferred_element_type=f32) + bq
    # NOTE: `torch.relu(q)` in the reference discards its result, so no relu is
    # applied to the hyper-net input (faithful to the source).

    # ---- hyper-net conv batched over all windows ------------------------------
    # h[n, c] = sum_t sum_d qp[n+t, d] * conv_w[c, d, t]
    cw = cw_ref[...]                                               # (KH*D, C)
    h = jnp.dot(qp[0:N, :], cw[0:D, :], preferred_element_type=f32)
    for t in range(1, KH):                                         # KH = 5, static
        h = h + jnp.dot(qp[t:t + N, :], cw[t * D:(t + 1) * D, :],
                        preferred_element_type=f32)
    h = jnp.maximum(h + cb, 0.0)                                   # (N, C)
    w_all = jax.nn.sigmoid(
        jnp.dot(h, fw_ref[...], preferred_element_type=f32) + fb)  # (N, C)
    w_all = w_all * (1.0 / C)                                      # fold mean's 1/C

    # ---- windowed weighted mean: C shifted-slice multiply-adds on (N, D) -----
    # out[n, :] = sum_c w_all[n, c] * kcomb[n + c, :]   (1/C already folded in)
    out = w_all[:, 0:1] * kcomb[0:N, :]
    for c in range(1, C):                                          # C = 8, static
        out = out + w_all[:, c:c + 1] * kcomb[c:c + N, :]

    out_ref[0] = out.astype(out_ref.dtype)                         # single slab store


def add_transformer_forward(query, key, value, params, cache_len):
    """query: (B, Lq, D); key/value: (B, S, D). Returns (B, Lq-4, D)."""
    B, Lq, D = query.shape
    _, S, _ = key.shape
    KH = HYPER_KERNEL
    N = Lq - (KH - 1) * HYPER_LAYER
    C = cache_len
    assert S >= N - 1 + C, "key/value too short for full cache windows"

    # ---- glue: kernel-friendly (in, out) layouts + packed small params --------
    wq_t = params["wq_w"].T                                  # (D, D)
    wk_t = params["wk_w"].T
    wv_t = params["wv_w"].T
    ln_pack = jnp.stack([params["lnq_g"], params["lnq_b"],
                         params["lnk_g"], params["lnk_b"],
                         params["lnv_g"], params["lnv_b"]], axis=0)       # (6, D)
    bias_pack = jnp.stack([params["wq_b"], params["wk_b"],
                           params["wv_b"]], axis=0)                        # (3, D)
    # Conv1d weight (C, D, KH) -> matmul weight (KH*D, C), row index t*D + d
    cw = jnp.transpose(params["conv_w"], (2, 1, 0)).reshape(KH * D, C)
    fw_t = params["fnn_w"].T                                 # (C, C)
    cfb_pack = jnp.stack([params["conv_b"], params["fnn_b"]], axis=0)      # (2, C)

    # advisory cost estimate for the whole call
    flops = 2 * B * (2 * S * D * D + Lq * D * D + KH * N * D * C
                     + N * C * C + N * C * D)
    transcendentals = B * (N * C + 2 * S + Lq)
    bytes_accessed = 4 * (query.size + key.size + value.size
                          + 3 * D * D + 6 * D + 3 * D + KH * D * C
                          + C * C + 2 * C + B * N * D)

    grid_spec = pltpu.PrefetchScalarGridSpec(
        num_scalar_prefetch=0,
        grid=(B,),
        in_specs=[
            pl.BlockSpec((1, Lq, D), lambda b: (b, 0, 0)),   # query
            pl.BlockSpec((1, S, D), lambda b: (b, 0, 0)),    # key
            pl.BlockSpec((1, S, D), lambda b: (b, 0, 0)),    # value
            pl.BlockSpec((D, D), lambda b: (0, 0)),          # wq (T)
            pl.BlockSpec((D, D), lambda b: (0, 0)),          # wk (T)
            pl.BlockSpec((D, D), lambda b: (0, 0)),          # wv (T)
            pl.BlockSpec((6, D), lambda b: (0, 0)),          # LN params
            pl.BlockSpec((3, D), lambda b: (0, 0)),          # proj biases
            pl.BlockSpec((KH * D, C), lambda b: (0, 0)),     # conv weight
            pl.BlockSpec((C, C), lambda b: (0, 0)),          # fnn weight (T)
            pl.BlockSpec((2, C), lambda b: (0, 0)),          # conv/fnn biases
        ],
        out_specs=pl.BlockSpec((1, N, D), lambda b: (b, 0, 0)),
    )

    return pl.pallas_call(
        add_transformer_kernel,
        out_shape=jax.ShapeDtypeStruct((B, N, D), jnp.float32),
        grid_spec=grid_spec,
        compiler_params=pltpu.CompilerParams(
            dimension_semantics=("parallel",)),
        cost_estimate=pl.CostEstimate(flops=flops,
                                      transcendentals=transcendentals,
                                      bytes_accessed=bytes_accessed),
    )(query, key, value, wq_t, wk_t, wv_t,
      ln_pack, bias_pack, cw, fw_t, cfb_pack)


# ---------------------------------------------------------------------------
# pure-JAX reference (same math, no Pallas) for a correctness cross-check
# ---------------------------------------------------------------------------
def _reference(query, key, value, params, cache_len):
    B, Lq, D = query.shape
    N = Lq - (HYPER_KERNEL - 1) * HYPER_LAYER
    ln = lambda x, g, b: _layernorm(x, g.reshape(1, 1, D), b.reshape(1, 1, D))
    kn = ln(key, params["lnk_g"], params["lnk_b"])
    vn = ln(value, params["lnv_g"], params["lnv_b"])
    kp = jnp.maximum(kn @ params["wk_w"].T + params["wk_b"], 0.0)
    vp = vn @ params["wv_w"].T + params["wv_b"]
    kcomb = kp * vp
    outs = []
    for idx in range(N):
        q = query[:, idx:idx + HYPER_KERNEL, :]
        qn = ln(q, params["lnq_g"], params["lnq_b"])
        qp = qn @ params["wq_w"].T + params["wq_b"]
        h = jnp.einsum("bte,cet->bc", qp, params["conv_w"]) + params["conv_b"]
        h = jnp.maximum(h, 0.0)
        w = jax.nn.sigmoid(h @ params["fnn_w"].T + params["fnn_b"])
        tmp = kcomb[:, idx:idx + cache_len, :] * w[:, :, None]
        outs.append(jnp.mean(tmp, axis=1, keepdims=True))
    return jnp.concatenate(outs, axis=1)


if __name__ == "__main__":
    # small shapes implied by the forward: in_dim == out_dim (hyper_net consumes
    # the wq output), seq long enough for full cache_len windows.
    B, Lq, S, D, CACHE = 2, 16, 24, 32, 8

    key0 = jax.random.PRNGKey(0)
    ks = jax.random.split(key0, 16)
    f32 = jnp.float32
    params = {
        "wq_w": 0.1 * jax.random.normal(ks[0], (D, D), f32),
        "wq_b": 0.1 * jax.random.normal(ks[1], (D,), f32),
        "wk_w": 0.1 * jax.random.normal(ks[2], (D, D), f32),
        "wk_b": 0.1 * jax.random.normal(ks[3], (D,), f32),
        "wv_w": 0.1 * jax.random.normal(ks[4], (D, D), f32),
        "wv_b": 0.1 * jax.random.normal(ks[5], (D,), f32),
        "lnq_g": jnp.ones((D,), f32), "lnq_b": jnp.zeros((D,), f32),
        "lnk_g": jnp.ones((D,), f32), "lnk_b": jnp.zeros((D,), f32),
        "lnv_g": jnp.ones((D,), f32), "lnv_b": jnp.zeros((D,), f32),
        "conv_w": 0.1 * jax.random.normal(ks[6], (CACHE, D, HYPER_KERNEL), f32),
        "conv_b": 0.1 * jax.random.normal(ks[7], (CACHE,), f32),
        "fnn_w": 0.1 * jax.random.normal(ks[8], (CACHE, CACHE), f32),
        "fnn_b": 0.1 * jax.random.normal(ks[9], (CACHE,), f32),
    }

    query = jax.random.normal(ks[10], (B, Lq, D), f32)
    keyt = jax.random.normal(ks[11], (B, S, D), f32)
    value = jax.random.normal(ks[12], (B, S, D), f32)

    # TODO(synk): the reference forward calls builtin input() on query/ret
    # shapes (stdin side effect); intentionally omitted.
    out = add_transformer_forward(query, keyt, value, params, CACHE)
    out = jax.block_until_ready(out)

    ref = _reference(query, keyt, value, params, CACHE)
    assert out.shape == (B, Lq - (HYPER_KERNEL - 1) * HYPER_LAYER, D)
    assert jnp.allclose(out, ref, rtol=1e-4, atol=1e-4)

    print("KERNEL_OK")
</pallas_src>

<mosaic_0001>
module attributes {stable_mosaic.version = 11 : i64} {
  func.func @add_transformer_kernel(%arg0: i32, %arg1: memref<1x16x32xf32, #tpu.memory_space<vmem>>, %arg2: memref<1x24x32xf32, #tpu.memory_space<vmem>>, %arg3: memref<1x24x32xf32, #tpu.memory_space<vmem>>, %arg4: memref<32x32xf32, #tpu.memory_space<vmem>>, %arg5: memref<32x32xf32, #tpu.memory_space<vmem>>, %arg6: memref<32x32xf32, #tpu.memory_space<vmem>>, %arg7: memref<6x32xf32, #tpu.memory_space<vmem>>, %arg8: memref<3x32xf32, #tpu.memory_space<vmem>>, %arg9: memref<160x8xf32, #tpu.memory_space<vmem>>, %arg10: memref<8x8xf32, #tpu.memory_space<vmem>>, %arg11: memref<2x8xf32, #tpu.memory_space<vmem>>, %arg12: memref<1x12x32xf32, #tpu.memory_space<vmem>>) attributes {dimension_semantics = [#tpu.dimension_semantics<parallel>], iteration_bounds = array<i64: 2>, scalar_prefetch = 0 : i64, scratch_operands = 0 : i64, tpu.core_type = #tpu.core_type<tc>, window_params = [{transform_indices = @transform_0, window_bounds = array<i64: 1, 16, 32>}, {transform_indices = @transform_1, window_bounds = array<i64: 1, 24, 32>}, {transform_indices = @transform_2, window_bounds = array<i64: 1, 24, 32>}, {pipeline_mode = #tpu.pipeline_mode<synchronous>, transform_indices = @transform_3, window_bounds = array<i64: 32, 32>}, {pipeline_mode = #tpu.pipeline_mode<synchronous>, transform_indices = @transform_4, window_bounds = array<i64: 32, 32>}, {pipeline_mode = #tpu.pipeline_mode<synchronous>, transform_indices = @transform_5, window_bounds = array<i64: 32, 32>}, {pipeline_mode = #tpu.pipeline_mode<synchronous>, transform_indices = @transform_6, window_bounds = array<i64: 6, 32>}, {pipeline_mode = #tpu.pipeline_mode<synchronous>, transform_indices = @transform_7, window_bounds = array<i64: 3, 32>}, {pipeline_mode = #tpu.pipeline_mode<synchronous>, transform_indices = @transform_8, window_bounds = array<i64: 160, 8>}, {pipeline_mode = #tpu.pipeline_mode<synchronous>, transform_indices = @transform_9, window_bounds = array<i64: 8, 8>}, {pipeline_mode = #tpu.pipeline_mode<synchronous>, transform_indices = @transform_10, window_bounds = array<i64: 2, 8>}, {transform_indices = @transform_11, window_bounds = array<i64: 1, 12, 32>}]} {
    %c0 = arith.constant 0 : index
    %c0_0 = arith.constant 0 : index
    %0 = vector.load %arg7[%c0, %c0_0] : memref<6x32xf32, #tpu.memory_space<vmem>>, vector<1x32xf32>
    %c1 = arith.constant 1 : index
    %c0_1 = arith.constant 0 : index
    %1 = vector.load %arg7[%c1, %c0_1] : memref<6x32xf32, #tpu.memory_space<vmem>>, vector<1x32xf32>
    %c2 = arith.constant 2 : index
    %c0_2 = arith.constant 0 : index
    %2 = vector.load %arg7[%c2, %c0_2] : memref<6x32xf32, #tpu.memory_space<vmem>>, vector<1x32xf32>
    %c3 = arith.constant 3 : index
    %c0_3 = arith.constant 0 : index
    %3 = vector.load %arg7[%c3, %c0_3] : memref<6x32xf32, #tpu.memory_space<vmem>>, vector<1x32xf32>
    %c4 = arith.constant 4 : index
    %c0_4 = arith.constant 0 : index
    %4 = vector.load %arg7[%c4, %c0_4] : memref<6x32xf32, #tpu.memory_space<vmem>>, vector<1x32xf32>
    %c5 = arith.constant 5 : index
    %c0_5 = arith.constant 0 : index
    %5 = vector.load %arg7[%c5, %c0_5] : memref<6x32xf32, #tpu.memory_space<vmem>>, vector<1x32xf32>
    %c0_6 = arith.constant 0 : index
    %c0_7 = arith.constant 0 : index
    %6 = vector.load %arg8[%c0_6, %c0_7] : memref<3x32xf32, #tpu.memory_space<vmem>>, vector<1x32xf32>
    %c1_8 = arith.constant 1 : index
    %c0_9 = arith.constant 0 : index
    %7 = vector.load %arg8[%c1_8, %c0_9] : memref<3x32xf32, #tpu.memory_space<vmem>>, vector<1x32xf32>
    %c2_10 = arith.constant 2 : index
    %c0_11 = arith.constant 0 : index
    %8 = vector.load %arg8[%c2_10, %c0_11] : memref<3x32xf32, #tpu.memory_space<vmem>>, vector<1x32xf32>
    %c0_12 = arith.constant 0 : index
    %c0_13 = arith.constant 0 : index
    %9 = vector.load %arg11[%c0_12, %c0_13] : memref<2x8xf32, #tpu.memory_space<vmem>>, vector<1x8xf32>
    %c1_14 = arith.constant 1 : index
    %c0_15 = arith.constant 0 : index
    %10 = vector.load %arg11[%c1_14, %c0_15] : memref<2x8xf32, #tpu.memory_space<vmem>>, vector<1x8xf32>
    %c0_16 = arith.constant 0 : index
    %c0_17 = arith.constant 0 : index
    %c0_18 = arith.constant 0 : index
    %11 = vector.load %arg2[%c0_16, %c0_17, %c0_18] : memref<1x24x32xf32, #tpu.memory_space<vmem>>, vector<1x24x32xf32>
    %12 = vector.shape_cast %11 : vector<1x24x32xf32> to vector<24x32xf32>
    %cst = arith.constant dense<0.000000e+00> : vector<24xf32>
    %13 = vector.multi_reduction <add>, %12, %cst [1] : vector<24x32xf32> to vector<24xf32>
    %14 = vector.shape_cast %13 : vector<24xf32> to vector<24x1xf32>
    %cst_19 = arith.constant 3.200000e+01 : f32
    %15 = vector.broadcast %cst_19 : f32 to vector<24x1xf32>
    %16 = arith.divf %14, %15 : vector<24x1xf32>
    %17 = vector.broadcast %16 : vector<24x1xf32> to vector<24x32xf32>
    %18 = arith.subf %12, %17 : vector<24x32xf32>
    %19 = arith.mulf %18, %18 : vector<24x32xf32>
    %cst_20 = arith.constant dense<0.000000e+00> : vector<24xf32>
    %20 = vector.multi_reduction <add>, %19, %cst_20 [1] : vector<24x32xf32> to vector<24xf32>
    %21 = vector.shape_cast %20 : vector<24xf32> to vector<24x1xf32>
    %cst_21 = arith.constant 3.200000e+01 : f32
    %22 = vector.broadcast %cst_21 : f32 to vector<24x1xf32>
    %23 = arith.divf %21, %22 : vector<24x1xf32>
    %cst_22 = arith.constant 9.99999974E-6 : f32
    %24 = vector.broadcast %cst_22 : f32 to vector<24x1xf32>
    %25 = arith.addf %23, %24 : vector<24x1xf32>
    %26 = math.rsqrt %25 : vector<24x1xf32>
    %27 = vector.broadcast %26 : vector<24x1xf32> to vector<24x32xf32>
    %28 = arith.mulf %18, %27 : vector<24x32xf32>
    %29 = vector.broadcast %2 : vector<1x32xf32> to vector<24x32xf32>
    %30 = arith.mulf %28, %29 : vector<24x32xf32>
    %31 = vector.broadcast %3 : vector<1x32xf32> to vector<24x32xf32>
    %32 = arith.addf %30, %31 : vector<24x32xf32>
    %c0_23 = arith.constant 0 : index
    %c0_24 = arith.constant 0 : index
    %c0_25 = arith.constant 0 : index
    %33 = vector.load %arg3[%c0_23, %c0_24, %c0_25] : memref<1x24x32xf32, #tpu.memory_space<vmem>>, vector<1x24x32xf32>
    %34 = vector.shape_cast %33 : vector<1x24x32xf32> to vector<24x32xf32>
    %cst_26 = arith.constant dense<0.000000e+00> : vector<24xf32>
    %35 = vector.multi_reduction <add>, %34, %cst_26 [1] : vector<24x32xf32> to vector<24xf32>
    %36 = vector.shape_cast %35 : vector<24xf32> to vector<24x1xf32>
    %cst_27 = arith.constant 3.200000e+01 : f32
    %37 = vector.broadcast %cst_27 : f32 to vector<24x1xf32>
    %38 = arith.divf %36, %37 : vector<24x1xf32>
    %39 = vector.broadcast %38 : vector<24x1xf32> to vector<24x32xf32>
    %40 = arith.subf %34, %39 : vector<24x32xf32>
    %41 = arith.mulf %40, %40 : vector<24x32xf32>
    %cst_28 = arith.constant dense<0.000000e+00> : vector<24xf32>
    %42 = vector.multi_reduction <add>, %41, %cst_28 [1] : vector<24x32xf32> to vector<24xf32>
    %43 = vector.shape_cast %42 : vector<24xf32> to vector<24x1xf32>
    %cst_29 = arith.constant 3.200000e+01 : f32
    %44 = vector.broadcast %cst_29 : f32 to vector<24x1xf32>
    %45 = arith.divf %43, %44 : vector<24x1xf32>
    %cst_30 = arith.constant 9.99999974E-6 : f32
    %46 = vector.broadcast %cst_30 : f32 to vector<24x1xf32>
    %47 = arith.addf %45, %46 : vector<24x1xf32>
    %48 = math.rsqrt %47 : vector<24x1xf32>
    %49 = vector.broadcast %48 : vector<24x1xf32> to vector<24x32xf32>
    %50 = arith.mulf %40, %49 : vector<24x32xf32>
    %51 = vector.broadcast %4 : vector<1x32xf32> to vector<24x32xf32>
    %52 = arith.mulf %50, %51 : vector<24x32xf32>
    %53 = vector.broadcast %5 : vector<1x32xf32> to vector<24x32xf32>
    %54 = arith.addf %52, %53 : vector<24x32xf32>
    %c0_31 = arith.constant 0 : index
    %c0_32 = arith.constant 0 : index
    %55 = vector.load %arg5[%c0_31, %c0_32] : memref<32x32xf32, #tpu.memory_space<vmem>>, vector<32x32xf32>
    %cst_33 = arith.constant dense<0.000000e+00> : vector<24x32xf32>
    %56 = tpu.matmul %32, %55, %cst_33 {dimension_numbers = #tpu.dot_dimension_numbers<[1], [0], [0], [1], [0, 0, 1, 1], [], []>} : vector<24x32xf32>, vector<32x32xf32>, vector<24x32xf32> -> vector<24x32xf32>
    %57 = vector.broadcast %7 : vector<1x32xf32> to vector<24x32xf32>
    %58 = arith.addf %56, %57 : vector<24x32xf32>
    %cst_34 = arith.constant 0.000000e+00 : f32
    %59 = vector.broadcast %cst_34 : f32 to vector<24x32xf32>
    %60 = arith.maximumf %58, %59 : vector<24x32xf32>
    %c0_35 = arith.constant 0 : index
    %c0_36 = arith.constant 0 : index
    %61 = vector.load %arg6[%c0_35, %c0_36] : memref<32x32xf32, #tpu.memory_space<vmem>>, vector<32x32xf32>
    %cst_37 = arith.constant dense<0.000000e+00> : vector<24x32xf32>
    %62 = tpu.matmul %54, %61, %cst_37 {dimension_numbers = #tpu.dot_dimension_numbers<[1], [0], [0], [1], [0, 0, 1, 1], [], []>} : vector<24x32xf32>, vector<32x32xf32>, vector<24x32xf32> -> vector<24x32xf32>
    %63 = vector.broadcast %8 : vector<1x32xf32> to vector<24x32xf32>
    %64 = arith.addf %62, %63 : vector<24x32xf32>
    %65 = arith.mulf %60, %64 : vector<24x32xf32>
    %c0_38 = arith.constant 0 : index
    %c0_39 = arith.constant 0 : index
    %c0_40 = arith.constant 0 : index
    %66 = vector.load %arg1[%c0_38, %c0_39, %c0_40] : memref<1x16x32xf32, #tpu.memory_space<vmem>>, vector<1x16x32xf32>
    %67 = vector.shape_cast %66 : vector<1x16x32xf32> to vector<16x32xf32>
    %cst_41 = arith.constant dense<0.000000e+00> : vector<16xf32>
    %68 = vector.multi_reduction <add>, %67, %cst_41 [1] : vector<16x32xf32> to vector<16xf32>
    %69 = vector.shape_cast %68 : vector<16xf32> to vector<16x1xf32>
    %cst_42 = arith.constant 3.200000e+01 : f32
    %70 = vector.broadcast %cst_42 : f32 to vector<16x1xf32>
    %71 = arith.divf %69, %70 : vector<16x1xf32>
    %72 = vector.broadcast %71 : vector<16x1xf32> to vector<16x32xf32>
    %73 = arith.subf %67, %72 : vector<16x32xf32>
    %74 = arith.mulf %73, %73 : vector<16x32xf32>
    %cst_43 = arith.constant dense<0.000000e+00> : vector<16xf32>
    %75 = vector.multi_reduction <add>, %74, %cst_43 [1] : vector<16x32xf32> to vector<16xf32>
    %76 = vector.shape_cast %75 : vector<16xf32> to vector<16x1xf32>
    %cst_44 = arith.constant 3.200000e+01 : f32
    %77 = vector.broadcast %cst_44 : f32 to vector<16x1xf32>
    %78 = arith.divf %76, %77 : vector<16x1xf32>
    %cst_45 = arith.constant 9.99999974E-6 : f32
    %79 = vector.broadcast %cst_45 : f32 to vector<16x1xf32>
    %80 = arith.addf %78, %79 : vector<16x1xf32>
    %81 = math.rsqrt %80 : vector<16x1xf32>
    %82 = vector.broadcast %81 : vector<16x1xf32> to vector<16x32xf32>
    %83 = arith.mulf %73, %82 : vector<16x32xf32>
    %84 = vector.broadcast %0 : vector<1x32xf32> to vector<16x32xf32>
    %85 = arith.mulf %83, %84 : vector<16x32xf32>
    %86 = vector.broadcast %1 : vector<1x32xf32> to vector<16x32xf32>
    %87 = arith.addf %85, %86 : vector<16x32xf32>
    %c0_46 = arith.constant 0 : index
    %c0_47 = arith.constant 0 : index
    %88 = vector.load %arg4[%c0_46, %c0_47] : memref<32x32xf32, #tpu.memory_space<vmem>>, vector<32x32xf32>
    %cst_48 = arith.constant dense<0.000000e+00> : vector<16x32xf32>
    %89 = tpu.matmul %87, %88, %cst_48 {dimension_numbers = #tpu.dot_dimension_numbers<[1], [0], [0], [1], [0, 0, 1, 1], [], []>} : vector<16x32xf32>, vector<32x32xf32>, vector<16x32xf32> -> vector<16x32xf32>
    %90 = vector.broadcast %6 : vector<1x32xf32> to vector<16x32xf32>
    %91 = arith.addf %89, %90 : vector<16x32xf32>
    %c0_49 = arith.constant 0 : index
    %c0_50 = arith.constant 0 : index
    %92 = vector.load %arg9[%c0_49, %c0_50] : memref<160x8xf32, #tpu.memory_space<vmem>>, vector<160x8xf32>
    %93 = vector.extract_strided_slice %91 {offsets = [0, 0], sizes = [12, 32], strides = [1, 1]} : vector<16x32xf32> to vector<12x32xf32>
    %94 = vector.extract_strided_slice %92 {offsets = [0, 0], sizes = [32, 8], strides = [1, 1]} : vector<160x8xf32> to vector<32x8xf32>
    %cst_51 = arith.constant dense<0.000000e+00> : vector<12x8xf32>
    %95 = tpu.matmul %93, %94, %cst_51 {dimension_numbers = #tpu.dot_dimension_numbers<[1], [0], [0], [1], [0, 0, 1, 1], [], []>} : vector<12x32xf32>, vector<32x8xf32>, vector<12x8xf32> -> vector<12x8xf32>
    %96 = vector.extract_strided_slice %91 {offsets = [1, 0], sizes = [12, 32], strides = [1, 1]} : vector<16x32xf32> to vector<12x32xf32>
    %97 = vector.extract_strided_slice %92 {offsets = [32, 0], sizes = [32, 8], strides = [1, 1]} : vector<160x8xf32> to vector<32x8xf32>
    %cst_52 = arith.constant dense<0.000000e+00> : vector<12x8xf32>
    %98 = tpu.matmul %96, %97, %cst_52 {dimension_numbers = #tpu.dot_dimension_numbers<[1], [0], [0], [1], [0, 0, 1, 1], [], []>} : vector<12x32xf32>, vector<32x8xf32>, vector<12x8xf32> -> vector<12x8xf32>
    %99 = arith.addf %95, %98 : vector<12x8xf32>
    %100 = vector.extract_strided_slice %91 {offsets = [2, 0], sizes = [12, 32], strides = [1, 1]} : vector<16x32xf32> to vector<12x32xf32>
    %101 = vector.extract_strided_slice %92 {offsets = [64, 0], sizes = [32, 8], strides = [1, 1]} : vector<160x8xf32> to vector<32x8xf32>
    %cst_53 = arith.constant dense<0.000000e+00> : vector<12x8xf32>
    %102 = tpu.matmul %100, %101, %cst_53 {dimension_numbers = #tpu.dot_dimension_numbers<[1], [0], [0], [1], [0, 0, 1, 1], [], []>} : vector<12x32xf32>, vector<32x8xf32>, vector<12x8xf32> -> vector<12x8xf32>
    %103 = arith.addf %99, %102 : vector<12x8xf32>
    %104 = vector.extract_strided_slice %91 {offsets = [3, 0], sizes = [12, 32], strides = [1, 1]} : vector<16x32xf32> to vector<12x32xf32>
    %105 = vector.extract_strided_slice %92 {offsets = [96, 0], sizes = [32, 8], strides = [1, 1]} : vector<160x8xf32> to vector<32x8xf32>
    %cst_54 = arith.constant dense<0.000000e+00> : vector<12x8xf32>
    %106 = tpu.matmul %104, %105, %cst_54 {dimension_numbers = #tpu.dot_dimension_numbers<[1], [0], [0], [1], [0, 0, 1, 1], [], []>} : vector<12x32xf32>, vector<32x8xf32>, vector<12x8xf32> -> vector<12x8xf32>
    %107 = arith.addf %103, %106 : vector<12x8xf32>
    %108 = vector.extract_strided_slice %91 {offsets = [4, 0], sizes = [12, 32], strides = [1, 1]} : vector<16x32xf32> to vector<12x32xf32>
    %109 = vector.extract_strided_slice %92 {offsets = [128, 0], sizes = [32, 8], strides = [1, 1]} : vector<160x8xf32> to vector<32x8xf32>
    %cst_55 = arith.constant dense<0.000000e+00> : vector<12x8xf32>
    %110 = tpu.matmul %108, %109, %cst_55 {dimension_numbers = #tpu.dot_dimension_numbers<[1], [0], [0], [1], [0, 0, 1, 1], [], []>} : vector<12x32xf32>, vector<32x8xf32>, vector<12x8xf32> -> vector<12x8xf32>
    %111 = arith.addf %107, %110 : vector<12x8xf32>
    %112 = vector.broadcast %9 : vector<1x8xf32> to vector<12x8xf32>
    %113 = arith.addf %111, %112 : vector<12x8xf32>
    %cst_56 = arith.constant 0.000000e+00 : f32
    %114 = vector.broadcast %cst_56 : f32 to vector<12x8xf32>
    %115 = arith.maximumf %113, %114 : vector<12x8xf32>
    %c0_57 = arith.constant 0 : index
    %c0_58 = arith.constant 0 : index
    %116 = vector.load %arg10[%c0_57, %c0_58] : memref<8x8xf32, #tpu.memory_space<vmem>>, vector<8x8xf32>
    %cst_59 = arith.constant dense<0.000000e+00> : vector<12x8xf32>
    %117 = tpu.matmul %115, %116, %cst_59 {dimension_numbers = #tpu.dot_dimension_numbers<[1], [0], [0], [1], [0, 0, 1, 1], [], []>} : vector<12x8xf32>, vector<8x8xf32>, vector<12x8xf32> -> vector<12x8xf32>
    %118 = vector.broadcast %10 : vector<1x8xf32> to vector<12x8xf32>
    %119 = arith.addf %117, %118 : vector<12x8xf32>
    %120 = arith.negf %119 : vector<12x8xf32>
    %121 = math.exp %120 : vector<12x8xf32>
    %cst_60 = arith.constant 1.000000e+00 : f32
    %122 = vector.broadcast %cst_60 : f32 to vector<12x8xf32>
    %123 = arith.addf %122, %121 : vector<12x8xf32>
    %124 = arith.divf %122, %123 : vector<12x8xf32>
    %cst_61 = arith.constant 1.250000e-01 : f32
    %125 = vector.broadcast %cst_61 : f32 to vector<12x8xf32>
    %126 = arith.mulf %124, %125 : vector<12x8xf32>
    %127 = vector.extract_strided_slice %126 {offsets = [0, 0], sizes = [12, 1], strides = [1, 1]} : vector<12x8xf32> to vector<12x1xf32>
    %128 = vector.extract_strided_slice %65 {offsets = [0, 0], sizes = [12, 32], strides = [1, 1]} : vector<24x32xf32> to vector<12x32xf32>
    %129 = vector.broadcast %127 : vector<12x1xf32> to vector<12x32xf32>
    %130 = arith.mulf %129, %128 : vector<12x32xf32>
    %131 = vector.extract_strided_slice %126 {offsets = [0, 1], sizes = [12, 1], strides = [1, 1]} : vector<12x8xf32> to vector<12x1xf32>
    %132 = vector.extract_strided_slice %65 {offsets = [1, 0], sizes = [12, 32], strides = [1, 1]} : vector<24x32xf32> to vector<12x32xf32>
    %133 = vector.broadcast %131 : vector<12x1xf32> to vector<12x32xf32>
    %134 = arith.mulf %133, %132 : vector<12x32xf32>
    %135 = arith.addf %130, %134 : vector<12x32xf32>
    %136 = vector.extract_strided_slice %126 {offsets = [0, 2], sizes = [12, 1], strides = [1, 1]} : vector<12x8xf32> to vector<12x1xf32>
    %137 = vector.extract_strided_slice %65 {offsets = [2, 0], sizes = [12, 32], strides = [1, 1]} : vector<24x32xf32> to vector<12x32xf32>
    %138 = vector.broadcast %136 : vector<12x1xf32> to vector<12x32xf32>
    %139 = arith.mulf %138, %137 : vector<12x32xf32>
    %140 = arith.addf %135, %139 : vector<12x32xf32>
    %141 = vector.extract_strided_slice %126 {offsets = [0, 3], sizes = [12, 1], strides = [1, 1]} : vector<12x8xf32> to vector<12x1xf32>
    %142 = vector.extract_strided_slice %65 {offsets = [3, 0], sizes = [12, 32], strides = [1, 1]} : vector<24x32xf32> to vector<12x32xf32>
    %143 = vector.broadcast %141 : vector<12x1xf32> to vector<12x32xf32>
    %144 = arith.mulf %143, %142 : vector<12x32xf32>
    %145 = arith.addf %140, %144 : vector<12x32xf32>
    %146 = vector.extract_strided_slice %126 {offsets = [0, 4], sizes = [12, 1], strides = [1, 1]} : vector<12x8xf32> to vector<12x1xf32>
    %147 = vector.extract_strided_slice %65 {offsets = [4, 0], sizes = [12, 32], strides = [1, 1]} : vector<24x32xf32> to vector<12x32xf32>
    %148 = vector.broadcast %146 : vector<12x1xf32> to vector<12x32xf32>
    %149 = arith.mulf %148, %147 : vector<12x32xf32>
    %150 = arith.addf %145, %149 : vector<12x32xf32>
    %151 = vector.extract_strided_slice %126 {offsets = [0, 5], sizes = [12, 1], strides = [1, 1]} : vector<12x8xf32> to vector<12x1xf32>
    %152 = vector.extract_strided_slice %65 {offsets = [5, 0], sizes = [12, 32], strides = [1, 1]} : vector<24x32xf32> to vector<12x32xf32>
    %153 = vector.broadcast %151 : vector<12x1xf32> to vector<12x32xf32>
    %154 = arith.mulf %153, %152 : vector<12x32xf32>
    %155 = arith.addf %150, %154 : vector<12x32xf32>
    %156 = vector.extract_strided_slice %126 {offsets = [0, 6], sizes = [12, 1], strides = [1, 1]} : vector<12x8xf32> to vector<12x1xf32>
    %157 = vector.extract_strided_slice %65 {offsets = [6, 0], sizes = [12, 32], strides = [1, 1]} : vector<24x32xf32> to vector<12x32xf32>
    %158 = vector.broadcast %156 : vector<12x1xf32> to vector<12x32xf32>
    %159 = arith.mulf %158, %157 : vector<12x32xf32>
    %160 = arith.addf %155, %159 : vector<12x32xf32>
    %161 = vector.extract_strided_slice %126 {offsets = [0, 7], sizes = [12, 1], strides = [1, 1]} : vector<12x8xf32> to vector<12x1xf32>
    %162 = vector.extract_strided_slice %65 {offsets = [7, 0], sizes = [12, 32], strides = [1, 1]} : vector<24x32xf32> to vector<12x32xf32>
    %163 = vector.broadcast %161 : vector<12x1xf32> to vector<12x32xf32>
    %164 = arith.mulf %163, %162 : vector<12x32xf32>
    %165 = arith.addf %160, %164 : vector<12x32xf32>
    %c0_62 = arith.constant 0 : index
    %c0_63 = arith.constant 0 : index
    %c0_64 = arith.constant 0 : index
    %166 = vector.load %arg12[%c0_62, %c0_63, %c0_64] : memref<1x12x32xf32, #tpu.memory_space<vmem>>, vector<1x12x32xf32>
    %167 = vector.shape_cast %166 : vector<1x12x32xf32> to vector<12x32xf32>
    %168 = vector.shape_cast %165 : vector<12x32xf32> to vector<1x12x32xf32>
    tpu.vector_store %arg12[%c0_62, %c0_63, %c0_64], %168 {strides = array<i32>} : memref<1x12x32xf32, #tpu.memory_space<vmem>>, vector<1x12x32xf32>,
    return
  }
  func.func @transform_0(%arg0: i32) -> (i32, i32, i32) {
    %c0_i32 = arith.constant 0 : i32
    %c0_i32_0 = arith.constant 0 : i32
    %c0_i32_1 = arith.constant 0 : i32
    return %arg0, %c0_i32, %c0_i32_0 : i32, i32, i32
  }
  func.func @transform_1(%arg0: i32) -> (i32, i32, i32) {
    %c0_i32 = arith.constant 0 : i32
    %c0_i32_0 = arith.constant 0 : i32
    %c0_i32_1 = arith.constant 0 : i32
    return %arg0, %c0_i32, %c0_i32_0 : i32, i32, i32
  }
  func.func @transform_2(%arg0: i32) -> (i32, i32, i32) {
    %c0_i32 = arith.constant 0 : i32
    %c0_i32_0 = arith.constant 0 : i32
    %c0_i32_1 = arith.constant 0 : i32
    return %arg0, %c0_i32, %c0_i32_0 : i32, i32, i32
  }
  func.func @transform_3(%arg0: i32) -> (i32, i32) {
    %c0_i32 = arith.constant 0 : i32
    %c0_i32_0 = arith.constant 0 : i32
    %c0_i32_1 = arith.constant 0 : i32
    return %c0_i32, %c0_i32_0 : i32, i32
  }
  func.func @transform_4(%arg0: i32) -> (i32, i32) {
    %c0_i32 = arith.constant 0 : i32
    %c0_i32_0 = arith.constant 0 : i32
    %c0_i32_1 = arith.constant 0 : i32
    return %c0_i32, %c0_i32_0 : i32, i32
  }
  func.func @transform_5(%arg0: i32) -> (i32, i32) {
    %c0_i32 = arith.constant 0 : i32
    %c0_i32_0 = arith.constant 0 : i32
    %c0_i32_1 = arith.constant 0 : i32
    return %c0_i32, %c0_i32_0 : i32, i32
  }
  func.func @transform_6(%arg0: i32) -> (i32, i32) {
    %c0_i32 = arith.constant 0 : i32
    %c0_i32_0 = arith.constant 0 : i32
    %c0_i32_1 = arith.constant 0 : i32
    return %c0_i32, %c0_i32_0 : i32, i32
  }
  func.func @transform_7(%arg0: i32) -> (i32, i32) {
    %c0_i32 = arith.constant 0 : i32
    %c0_i32_0 = arith.constant 0 : i32
    %c0_i32_1 = arith.constant 0 : i32
    return %c0_i32, %c0_i32_0 : i32, i32
  }
  func.func @transform_8(%arg0: i32) -> (i32, i32) {
    %c0_i32 = arith.constant 0 : i32
    %c0_i32_0 = arith.constant 0 : i32
    %c0_i32_1 = arith.constant 0 : i32
    return %c0_i32, %c0_i32_0 : i32, i32
  }
  func.func @transform_9(%arg0: i32) -> (i32, i32) {
    %c0_i32 = arith.constant 0 : i32
    %c0_i32_0 = arith.constant 0 : i32
    %c0_i32_1 = arith.constant 0 : i32
    return %c0_i32, %c0_i32_0 : i32, i32
  }
  func.func @transform_10(%arg0: i32) -> (i32, i32) {
    %c0_i32 = arith.constant 0 : i32
    %c0_i32_0 = arith.constant 0 : i32
    %c0_i32_1 = arith.constant 0 : i32
    return %c0_i32, %c0_i32_0 : i32, i32
  }
  func.func @transform_11(%arg0: i32) -> (i32, i32, i32) {
    %c0_i32 = arith.constant 0 : i32
    %c0_i32_0 = arith.constant 0 : i32
    %c0_i32_1 = arith.constant 0 : i32
    return %arg0, %c0_i32, %c0_i32_0 : i32, i32, i32
  }
}

</mosaic_0001>

<bundles_post_ra>
// kernel: tpu_custom_call.1
= control target key start
LH: loop header
LB: loop body
LE: loop exit
PB: predicated region body
PF: predicated region fallthrough
CT: control target
= control target key end

     0   :  { %16 = vsyncpa [#allocation3], 0  ;;  %s1962_s0 = inlined_call_operand.vmem [shape: f32[2,16,32], index: 0, kind: input, shape index: {}]   ;;  %s1963_s1 = inlined_call_operand.vmem [shape: f32[2,24,32], index: 1, kind: input, shape index: {}]   ;;  %s1964_s2 = inlined_call_operand.vmem [shape: f32[2,24,32], index: 2, kind: input, shape index: {}]   ;;  %s1965_s3 = inlined_call_operand.vmem [shape: f32[32,32], index: 3, kind: input, shape index: {}]   ;;  %s1966_s4 = inlined_call_operand.hbm [shape: f32[32,32], index: 4, kind: input, shape index: {}]   ;;  %s1967_s5 = inlined_call_operand.hbm [shape: f32[32,32], index: 5, kind: input, shape index: {}]   ;;  %s1968_s6 = inlined_call_operand.vmem [shape: f32[6,32], index: 6, kind: input, shape index: {}]   ;;  %s1969_s7 = inlined_call_operand.vmem [shape: f32[3,32], index: 7, kind: input, shape index: {}]   ;;  %s1970_s8 = inlined_call_operand.vmem [shape: f32[160,8], index: 8, kind: input, shape index: {}]   ;;  %s1971_s9 = inlined_call_operand.vmem [shape: f32[8,8], index: 9, kind: input, shape index: {}]   ;;  %s1972_s10 = inlined_call_operand.vmem [shape: f32[2,8], index: 10, kind: input, shape index: {}]   ;;  %s1973_s11 = inlined_call_operand.vmem [shape: f32[2,12,32], index: 11, kind: output, shape index: {}]  }
   0x1   :  { %17 = vsyncpa [#allocation5], 0  ;;  %s1597_s17 = smov 0  }
   0x2 LB: > { %s314_s20 = sshll.u32 %s1966_s4, 4  ;;  %s1309_s21 = sadd.s32 4294967295, %s1522_s17   ;;  %s1522_s17 = sphi %s1597_s17, %s23_s17   ;;  %s315_s20 = int_to_ptr.hbm [resolvable:$true] %s314_s20 }
   0x3   : > { %p1311_p0 = scmp.ge.s32.totalorder %s1522_s17, 1  ;;  %p300_p1 = scmp.lt.s32.totalorder %s1522_s17, 3 }
   0x4   : > { %p1370_p2 = scmp.eq.s32.totalorder %s1309_s21, 0  ;;  %s1524_s23 = smov [#allocation2]  }
   0x5   : > { %p1608_p3 = pnand %p1311_p0, %p300_p1  ;;  %s316_s24 = sshll.u32 %s1524_s23, 4  ;;  %s317_s24 = int_to_ptr.vmem [resolvable:$true] %s316_s24 }
   0x6   : > { %s328_s27 = sshll.u32 %s1967_s5, 4  ;;  %s1525_s28 = smov [#allocation4]   ;;  %s329_s27 = int_to_ptr.hbm [resolvable:$true] %s328_s27 }
   0x7   : > { %p1363_p4 = pneg %p1608_p3  ;;  %s330_s29 = sshll.u32 %s1525_s28, 4  ;;  %s331_s29 = int_to_ptr.vmem [resolvable:$true] %s330_s29 }
   0x8   : > { %s1526_s30 = smov 128   ;;  %s1527_s12 = smov 8  }
   0x9   : > { %p1364_p5 = pnand %p1370_p2, %p1363_p4  ;;  %385 = sbr.rel (%p1608_p3) target bundleno = 926 (0x39e), region = 64 }
   0xb   : > { %1366 = dma.hbm_to_vmem [thread:$0]  (!%p1364_p5), %s315_s20, 512, %s317_s24, [#allocation3], %s1526_s30, %s1526_s30, %s1527_s12  }
   0xc   : > { %1369 = dma.hbm_to_vmem [thread:$0]  (!%p1364_p5), %s329_s27, 512, %s331_s29, [#allocation5], %s1526_s30, %s1526_s30, %s1527_s12  }
   0xe   : > { %1513 = dma.done.wait (%p1370_p2), [#allocation3], 512  }
   0xf   : > { %1515 = vsyncadd (%p1370_p2), [#allocation3], 4294966784 }
  0x10   : > { %1517 = dma.done.wait (%p1370_p2), [#allocation5], 512  }
  0x11   : > { %1519 = vsyncadd (%p1370_p2), [#allocation5], 4294966784  ;;  %p441_p6 = scmp.lt.s32.totalorder %s1309_s21, 1  ;;  %vm475_vm0 = vcmask 261120   ;;  %v1528_v14 = vmov 32.0   ;;  %v775_v58 = vld [vmem:[%s1965_s3 + $0x18] sm:$0xff] }
  0x12   : > { %1422 = vrcp.f32 %v1528_v14  ;;  %795 = vmatpush.msra.mxu2 %v775_v58  ;;  %1350 = vmatpush.msra.mxu3 %v775_v58  ;;  %v774_v59 = vld [vmem:[%s1965_s3 + $0x10] sm:$0xff]  ;;  %v773_v60 = vld [vmem:[%s1965_s3 + $0x8] sm:$0xff]  ;;  %v772_v61 = vld [vmem:[%s1965_s3] sm:$0xff] }
  0x13   : > { %s1976_s21 = smov (!%p441_p6, %s1309_s21), 1  ;;  %v680_v62 = vld [vmem:[#allocation4 + $0x18] sm:$0xff] }
  0x14   : > { %s1348_s13 = sshll.u32 %s1976_s21, 4  ;;  %s1354_s14 = smul.u32 24, %s1976_s21  ;;  %796 = vmatpush.msra.mxu2 %v774_v59  ;;  %1351 = vmatpush.msra.mxu3 %v774_v59  ;;  %v637_v14 = vld [vmem:[#allocation2 + $0x18] sm:$0xff] }
  0x15   : > { %s445_s18 = scalar_lea.vmem %s1962_s0, %s1348_s13  ;;  %703 = vmatpush.msra.mxu1 %v680_v62  ;;  %660 = vmatpush.msra.mxu0 %v637_v14  ;;  %s460_s19 = scalar_lea.vmem %s1973_s11, %s1348_s13 }
  0x16   : > { %s450_s22 = scalar_lea.vmem %s1963_s1, %s1354_s14  ;;  %v720_v0 = vld [vmem:[%s445_s18] sm:$0xff]  ;;  %s1641_s25 = scalar_lea.vmem %s1964_s2, %s1354_s14  ;;  %v721_v4 = vld [vmem:[%s445_s18 + $0x8] sm:$0xff]  ;;  %797 = vmatpush.msra.mxu2 %v773_v60  ;;  %1352 = vmatpush.msra.mxu3 %v773_v60 }
  0x17   : > { %v472_v1 = vld [vmem:[%s450_s22] sm:$0xff]  ;;  %v722_v2 = vsel %vm475_vm0, %v720_v0, 0.0  ;;  %v725_v6 = vsel %vm475_vm0, %v721_v4, 0.0  ;;  %v473_v8 = vld [vmem:[%s450_s22 + $0x8] sm:$0xff]  ;;  %v474_v9 = vld [vmem:[%s450_s22 + $0x10] sm:$0xff] }
  0x18   : > { %v476_v3 = vsel %vm475_vm0, %v472_v1, 0.0  ;;  %723 = vadd.xlane.f32.xlu0 %v722_v2  ;;  %v557_v5 = vld [vmem:[%s1641_s25] sm:$0xff]  ;;  %v479_v10 = vsel %vm475_vm0, %v473_v8, 0.0  ;;  %v482_v11 = vsel %vm475_vm0, %v474_v9, 0.0  ;;  %v559_v12 = vld [vmem:[%s1641_s25 + $0x10] sm:$0xff]  ;;  %v1423_v15 = vpop.eup %1422  ;;  %v1674_v42 = vld [vmem:[%s1641_s25 + $0x8] sm:$0xff]  ;;  %798 = vmatpush.msra.mxu2 %v772_v61 }
  0x19   : > { %477 = vadd.xlane.f32.xlu2 %v476_v3  ;;  %v560_v7 = vsel %vm475_vm0, %v557_v5, 0.0  ;;  %v566_v13 = vsel %vm475_vm0, %v559_v12, 0.0  ;;  %v486_v16 = vmul.f32 32.0, %v1423_v15  ;;  %vm490_vm1 = vweird.f32 %v1423_v15  ;;  %1353 = vmatpush.msra.mxu3 %v772_v61  ;;  %v678_v3 = vld [vmem:[#allocation4 + $0x8] sm:$0xff] }
  0x1a   : > { %v563_v46 = vsel %vm475_vm0, %v1674_v42, 0.0 }
  0x1b   : > { %v487_v17 = vsub.f32 1.0, %v486_v16 }
  0x1d   : > { %v488_v18 = vmul.f32 %v1423_v15, %v487_v17 }
  0x1f   : > { %v489_v19 = vadd.f32 %v1423_v15, %v488_v18 }
  0x20   : > { %726 = vadd.xlane.f32.xlu0 %v725_v6 }
  0x21   : > { %561 = vadd.xlane.f32.xlu2 %v560_v7  ;;  %v1650_v20 = vsel %vm490_vm1, %v1423_v15, %v489_v19  ;;  %v636_v15 = vld [vmem:[#allocation2 + $0x10] sm:$0xff] }
  0x22   : > { %661 = vmatpush.msra.mxu0 %v636_v15 }
  0x28   : > { %480 = vadd.xlane.f32.xlu0 %v479_v10 }
  0x29   : > { %483 = vadd.xlane.f32.xlu2 %v482_v11 }
  0x30   : > { %567 = vadd.xlane.f32.xlu0 %v566_v13 }
  0x8b   : > { %v724_v21 = vpop.xlane.xlu0 %723 }
  0x8c   : > { %v478_v22 = vpop.xlane.xlu2 %477  ;;  %v728_v23 = vmul.f32 %v724_v21, %v1650_v20 }
  0x8d   : > { %v492_v39 = vmul.f32 %v1650_v20, %v478_v22 }
  0x8e   : > { %v1653_v24 = vsub.f32 %v720_v0, %v728_v23  ;;  %v635_v23 = vld [vmem:[#allocation2 + $0x8] sm:$0xff] }
  0x8f   : > { %v1680_v45 = vsub.f32 %v472_v1, %v492_v39  ;;  %v679_v1 = vld [vmem:[#allocation4 + $0x10] sm:$0xff]  ;;  %662 = vmatpush.msra.mxu0 %v635_v23  ;;  %v1411_v39 = vld [vmem:[%s1968_s6] ss:$0 sm:$0xff]  ;;  %v1415_v23 = vld [vmem:[%s1968_s6 + $0x2] ss:$0 sm:$0xff] }
  0x90   : > { %v732_v25 = vmul.f32 %v1653_v24, %v1653_v24  ;;  %704 = vmatpush.msra.mxu1 %v679_v1 }
  0x91   : > { %v498_v53 = vmul.f32 %v1680_v45, %v1680_v45 }
  0x92   : > { %v734_v26 = vsel %vm475_vm0, %v732_v25, 0.0  ;;  %705 = vmatpush.msra.mxu1 %v678_v3  ;;  %v1750_v3 = vld [vmem:[%s1968_s6 + $0x5] ss:$0 sm:$0xff] }
  0x93   : > { %735 = vadd.xlane.f32.xlu1 %v734_v26  ;;  %v727_v27 = vpop.xlane.xlu0 %726  ;;  %v501_v56 = vsel %vm475_vm0, %v498_v53, 0.0 }
  0x94   : > { %v562_v28 = vpop.xlane.xlu2 %561  ;;  %v729_v29 = vmul.f32 %v727_v27, %v1650_v20 }
  0x95   : > { %v569_v30 = vmul.f32 %v562_v28, %v1650_v20 }
  0x96   : > { %v1660_v31 = vsub.f32 %v721_v4, %v729_v29  ;;  %v677_v4 = vld [vmem:[#allocation4] sm:$0xff] }
  0x97   : > { %v1662_v32 = vsub.f32 %v557_v5, %v569_v30  ;;  %706 = vmatpush.msra.mxu1 %v677_v4  ;;  %v634_v30 = vld [vmem:[#allocation2] sm:$0xff] }
  0x98   : > { %v733_v33 = vmul.f32 %v1660_v31, %v1660_v31  ;;  %663 = vmatpush.msra.mxu0 %v634_v30 }
  0x99   : > { %v575_v34 = vmul.f32 %v1662_v32, %v1662_v32 }
  0x9a   : > { %v737_v35 = vsel %vm475_vm0, %v733_v33, 0.0 }
  0x9b   : > { %v578_v36 = vsel %vm475_vm0, %v575_v34, 0.0  ;;  %738 = vadd.xlane.f32.xlu1 %v737_v35  ;;  %v481_v37 = vpop.xlane.xlu0 %480 }
  0x9c   : > { %579 = vadd.xlane.f32.xlu2 %v578_v36  ;;  %v484_v38 = vpop.xlane.xlu2 %483  ;;  %v493_v40 = vmul.f32 %v1650_v20, %v481_v37 }
  0x9d   : > { %v494_v41 = vmul.f32 %v1650_v20, %v484_v38 }
  0x9e   : > { %v1676_v43 = vsub.f32 %v473_v8, %v493_v40 }
  0x9f   : > { %v1678_v44 = vsub.f32 %v474_v9, %v494_v41 }
  0xa0   : > { %v499_v47 = vmul.f32 %v1676_v43, %v1676_v43 }
  0xa1   : > { %v500_v48 = vmul.f32 %v1678_v44, %v1678_v44 }
  0xa2   : > { %v504_v49 = vsel %vm475_vm0, %v499_v47, 0.0 }
  0xa3   : > { %v507_v50 = vsel %vm475_vm0, %v500_v48, 0.0  ;;  %564 = vadd.xlane.f32.xlu1 %v563_v46  ;;  %505 = vadd.xlane.f32.xlu0 %v504_v49  ;;  %v568_v51 = vpop.xlane.xlu0 %567  ;;  %v1412_v49 = vld [vmem:[%s1968_s6 + $0x1] ss:$0 sm:$0xff] }
  0xa4   : > { %v571_v52 = vmul.f32 %v568_v51, %v1650_v20  ;;  %508 = vadd.xlane.f32.xlu2 %v507_v50 }
  0xa6   : > { %v1693_v54 = vsub.f32 %v559_v12, %v571_v52 }
  0xa8   : > { %v577_v55 = vmul.f32 %v1693_v54, %v1693_v54 }
  0xaa   : > { %v584_v57 = vsel %vm475_vm0, %v577_v55, 0.0 }
  0xab   : > { %585 = vadd.xlane.f32.xlu0 %v584_v57  ;;  %502 = vadd.xlane.f32.xlu1 %v501_v56 }
 0x106   : > { %v736_v63 = vpop.xlane.xlu1 %735 }
 0x107   : > { %v740_v0 = vmul.f32 %v736_v63, %v1650_v20  ;;  %v1743_v63 = vld [vmem:[%s1968_s6 + $0x4] ss:$0 sm:$0xff] }
 0x109   : > { %v742_v2 = vadd.f32 1e-05, %v740_v0 }
 0x10b   : > { %1424 = vrsqrt.f32 %v742_v2  ;;  %vm750_vm3 = vweird.f32 %v742_v2 }
 0x10e   : > { %v739_v5 = vpop.xlane.xlu1 %738 }
 0x10f   : > { %v580_v6 = vpop.xlane.xlu2 %579  ;;  %v741_v7 = vmul.f32 %v739_v5, %v1650_v20 }
 0x110   : > { %v587_v8 = vmul.f32 %v580_v6, %v1650_v20 }
 0x111   : > { %v1425_v9 = vpop.eup %1424  ;;  %v743_v10 = vadd.f32 1e-05, %v741_v7 }
 0x112   : > { %v590_v11 = vadd.f32 1e-05, %v587_v8  ;;  %v745_v12 = vmul.f32 %v1425_v9, %v742_v2  ;;  %vm751_vm2 = vweird.f32 %v1425_v9 }
 0x113   : > { %1426 = vrsqrt.f32 %v743_v10  ;;  %vm752_vm4 = vmor %vm750_vm3, %vm751_vm2  ;;  %vm760_vm8 = vweird.f32 %v743_v10 }
 0x114   : > { %v746_v13 = vmul.f32 %v1425_v9, %v745_v12  ;;  %1428 = vrsqrt.f32 %v590_v11  ;;  %vm599_vm5 = vweird.f32 %v590_v11 }
 0x116   : > { %v747_v16 = vmul.f32 0.5, %v746_v13  ;;  %v565_v17 = vpop.xlane.xlu1 %564  ;;  %v506_v18 = vpop.xlane.xlu0 %505 }
 0x117   : > { %v570_v19 = vmul.f32 %v565_v17, %v1650_v20  ;;  %v511_v21 = vmul.f32 %v506_v18, %v1650_v20  ;;  %v509_v22 = vpop.xlane.xlu2 %508 }
 0x118   : > { %v748_v25 = vsub.f32 1.5, %v747_v16  ;;  %v512_v29 = vmul.f32 %v509_v22, %v1650_v20 }
 0x119   : > { %v1427_v26 = vpop.eup %1426  ;;  %v1717_v27 = vsub.f32 %v1674_v42, %v570_v19  ;;  %v1719_v28 = vadd.f32 1e-05, %v511_v21 }
 0x11a   : > { %v1429_v33 = vpop.eup %1428  ;;  %v749_v34 = vmul.f32 %v1425_v9, %v748_v25  ;;  %v755_v35 = vmul.f32 %v1427_v26, %v743_v10  ;;  %v1726_v41 = vadd.f32 1e-05, %v512_v29  ;;  %vm761_vm7 = vweird.f32 %v1427_v26 }
 0x11b   : > { %v594_v36 = vmul.f32 %v1429_v33, %v590_v11  ;;  %1430 = vrsqrt.f32 %v1719_v28  ;;  %v576_v42 = vmul.f32 %v1717_v27, %v1717_v27  ;;  %vm600_vm6 = vweird.f32 %v1429_v33  ;;  %vm762_vm10 = vmor %vm760_vm8, %vm761_vm7 }
 0x11c   : > { %v753_v37 = vsel %vm752_vm4, %v1425_v9, %v749_v34  ;;  %v756_v38 = vmul.f32 %v1427_v26, %v755_v35  ;;  %1432 = vrsqrt.f32 %v1726_v41  ;;  %vm601_vm9 = vmor %vm599_vm5, %vm600_vm6  ;;  %vm532_vm13 = vweird.f32 %v1719_v28 }
 0x11d   : > { %v595_v40 = vmul.f32 %v1429_v33, %v594_v36  ;;  %v764_v46 = vmul.f32 %v753_v37, %v1653_v24  ;;  %v581_v51 = vsel %vm475_vm0, %v576_v42, 0.0  ;;  %vm542_vm2 = vweird.f32 %v1726_v41 }
 0x11e   : > { %v757_v47 = vmul.f32 0.5, %v756_v38  ;;  %v503_v48 = vpop.xlane.xlu1 %502  ;;  %582 = vadd.xlane.f32.xlu1 %v581_v51  ;;  %v820_v51 = vld [vmem:[%s1970_s8 + $0x70] sm:$0xff] }
 0x11f   : > { %v596_v50 = vmul.f32 0.5, %v595_v40  ;;  %v510_v52 = vmul.f32 %v503_v48, %v1650_v20  ;;  %v767_v55 = vmul.f32 %v1411_v39, %v764_v46  ;;  %v586_v40 = vpop.xlane.xlu0 %585  ;;  %v806_v46 = vld [vmem:[%s1970_s8] sm:$0xff]  ;;  %v813_v48 = vld [vmem:[%s1970_s8 + $0x38] sm:$0xff] }
 0x120   : > { %v758_v53 = vsub.f32 1.5, %v757_v47  ;;  %v589_v42 = vmul.f32 %v586_v40, %v1650_v20  ;;  %848 = vmatpush.msrb.mxu3 %v813_v48  ;;  %v1419_v40 = vld [vmem:[%s1969_s7 + $0x1] ss:$0 sm:$0xff] }
 0x121   : > { %v1431_v56 = vpop.eup %1430  ;;  %v597_v57 = vsub.f32 1.5, %v596_v50  ;;  %v513_v24 = vadd.f32 1e-05, %v510_v52  ;;  %v770_v59 = vadd.f32 %v1412_v49, %v767_v55  ;;  %v812_v50 = vld [vmem:[%s1970_s8 + $0x30] sm:$0xff]  ;;  %v811_v52 = vld [vmem:[%s1970_s8 + $0x28] sm:$0xff]  ;;  %v810_v55 = vld [vmem:[%s1970_s8 + $0x20] sm:$0xff] }
 0x122   : > { %v759_v58 = vmul.f32 %v1427_v26, %v758_v53  ;;  %v527_v61 = vmul.f32 %v1431_v56, %v1719_v28  ;;  %v1433_v4 = vpop.eup %1432  ;;  %vm533_vm14 = vweird.f32 %v1431_v56  ;;  %v1416_v28 = vld [vmem:[%s1968_s6 + $0x3] ss:$0 sm:$0xff]  ;;  %v592_v47 = vadd.f32 1e-05, %v589_v42  ;;  %849 = vmatpush.msrb.mxu3 %v812_v50  ;;  %v819_v53 = vld [vmem:[%s1970_s8 + $0x68] sm:$0xff] }
 0x123   : > { %v598_v60 = vmul.f32 %v1429_v33, %v597_v57  ;;  %1434 = vrsqrt.f32 %v513_v24  ;;  %1330 = vmatmul.msk.f32.vlgmr.msra.gmra.mxu2 %vm475_vm0, %v770_v59  ;;  %v537_v10 = vmul.f32 %v1433_v4, %v1726_v41  ;;  %vm522_vm11 = vweird.f32 %v513_v24  ;;  %vm534_vm1 = vmor %vm532_vm13, %vm533_vm14  ;;  %v808_v41 = vld [vmem:[%s1970_s8 + $0x10] sm:$0xff]  ;;  %v817_v59 = vld [vmem:[%s1970_s8 + $0x58] sm:$0xff] }
 0x124   : > { %v763_v62 = vsel %vm762_vm10, %v1427_v26, %v759_v58  ;;  %v528_v5 = vmul.f32 %v1431_v56, %v527_v61  ;;  %vm543_vm3 = vweird.f32 %v1433_v4  ;;  %1436 = vrsqrt.f32 %v592_v47  ;;  %850 = vmatpush.msrb.mxu3 %v811_v52 }
 0x125   : > { %v602_v0 = vsel %vm601_vm9, %v1429_v33, %v598_v60  ;;  %v765_v1 = vmul.f32 %v763_v62, %v1660_v31  ;;  %v538_v13 = vmul.f32 %v1433_v4, %v537_v10  ;;  %vm544_vm4 = vmor %vm542_vm2, %vm543_vm3  ;;  %v825_v62 = vld [vmem:[%s1970_s8 + $0x98] sm:$0xff]  ;;  %vm619_vm7 = vweird.f32 %v592_v47 }
 0x126   : > { %v623_v2 = vmul.f32 %v602_v0, %v1662_v32  ;;  %v529_v12 = vmul.f32 0.5, %v528_v5  ;;  %851 = vmatpush.msrb.mxu3 %v810_v55  ;;  %972 = vmatpush.msrb.mxu1 %v825_v62  ;;  %v824_v0 = vld [vmem:[%s1970_s8 + $0x90] sm:$0xff]  ;;  %v815_v5 = vld [vmem:[%s1970_s8 + $0x48] sm:$0xff]  ;;  %vm952_vm13 = vcmask 1043456   ;;  %vm886_vm14 = vcmask 1045504  }
 0x127   : > { %v768_v6 = vmul.f32 %v1411_v39, %v765_v1  ;;  %v539_v18 = vmul.f32 0.5, %v538_v13  ;;  %v823_v1 = vld [vmem:[%s1970_s8 + $0x88] sm:$0xff]  ;;  %vm1193_vm2 = vcmask 1040384   ;;  %vm992_vm3 = vcmask 64512  }
 0x128   : > { %v627_v7 = vmul.f32 %v1743_v63, %v623_v2  ;;  %v530_v14 = vsub.f32 1.5, %v529_v12  ;;  %973 = vmatpush.msrb.mxu1 %v824_v0  ;;  %v1417_v12 = vld [vmem:[%s1969_s7] ss:$0 sm:$0xff] }
 0x129   : > { %v771_v8 = vadd.f32 %v1412_v49, %v768_v6  ;;  %v1435_v9 = vpop.eup %1434  ;;  %v540_v26 = vsub.f32 1.5, %v539_v18  ;;  %v821_v49 = vld [vmem:[%s1970_s8 + $0x78] sm:$0xff]  ;;  %v822_v6 = vld [vmem:[%s1970_s8 + $0x80] sm:$0xff] }
 0x12a   : > { %v631_v11 = vadd.f32 %v1750_v3, %v627_v7  ;;  %v517_v31 = vmul.f32 %v1435_v9, %v513_v24  ;;  %vm523_vm12 = vweird.f32 %v1435_v9  ;;  %v531_v17 = vmul.f32 %v1431_v56, %v530_v14  ;;  %939 = vmatpush.msrb.mxu0 %v821_v49  ;;  %v1437_v24 = vpop.eup %1436  ;;  %974 = vmatpush.msrb.mxu1 %v823_v1 }
 0x12b   : > { %1331 = vmatmul.msk.f32.vlgmr.msra.gmra.mxu3 %vm475_vm0, %v771_v8  ;;  %vm524_vm15 = vmor %vm522_vm11, %vm523_vm12  ;;  %v541_v34 = vmul.f32 %v1433_v4, %v540_v26  ;;  %v614_v61 = vmul.f32 %v1437_v24, %v592_v47  ;;  %vm620_vm8 = vweird.f32 %v1437_v24  ;;  %vm828_vm11 = vcmask 1046528  }
 0x12c   : > { %1327 = vmatmul.msk.f32.vlgmr.msra.gmra.mxu1 %vm475_vm0, %v631_v11  ;;  %v518_v32 = vmul.f32 %v1435_v9, %v517_v31  ;;  %v535_v25 = vsel %vm534_vm1, %v1431_v56, %v531_v17  ;;  %940 = vmatpush.msrb.mxu0 %v820_v51  ;;  %v818_v56 = vld [vmem:[%s1970_s8 + $0x60] sm:$0xff]  ;;  %vm621_vm10 = vmor %vm619_vm7, %vm620_vm8  ;;  %vm919_vm12 = vcmask 1044480   ;;  %vm1173_vm1 = vcmask 1041408  }
 0x12d   : > { %v547_v33 = vmul.f32 %v535_v25, %v1676_v43  ;;  %v545_v35 = vsel %vm544_vm4, %v1433_v4, %v541_v34  ;;  %v809_v43 = vld [vmem:[%s1970_s8 + $0x18] sm:$0xff]  ;;  %906 = vmatpush.msra.mxu3 %v817_v59  ;;  %v816_v4 = vld [vmem:[%s1970_s8 + $0x50] sm:$0xff]  ;;  %975 = vmatpush.msrb.mxu1 %v822_v6  ;;  %v814_v31 = vld [vmem:[%s1970_s8 + $0x40] sm:$0xff] }
 0x12e   : > { %v519_v15 = vmul.f32 0.5, %v518_v32  ;;  %v548_v37 = vmul.f32 %v545_v35, %v1678_v44  ;;  %875 = vmatpush.msrb.mxu2 %v809_v43  ;;  %v807_v44 = vld [vmem:[%s1970_s8 + $0x8] sm:$0xff]  ;;  %941 = vmatpush.msrb.mxu0 %v819_v53  ;;  %v990_v43 = vld [vmem:[%s1971_s9] sm:$0xff] }
 0x12f   : > { %907 = vmatpush.msra.mxu3 %v816_v4 }
 0x130   : > { %v520_v16 = vsub.f32 1.5, %v519_v15  ;;  %v552_v38 = vmul.f32 %v1415_v23, %v548_v37  ;;  %876 = vmatpush.msrb.mxu2 %v808_v41  ;;  %942 = vmatpush.msrb.mxu0 %v818_v56 }
 0x131   : > { %908 = vmatpush.msra.mxu3 %v815_v5 }
 0x132   : > { %v521_v19 = vmul.f32 %v1435_v9, %v520_v16  ;;  %v556_v39 = vadd.f32 %v1416_v28, %v552_v38  ;;  %877 = vmatpush.msrb.mxu2 %v807_v44  ;;  %v1418_v44 = vld [vmem:[%s1969_s7 + $0x2] ss:$0 sm:$0xff] }
 0x133   : > { %909 = vmatpush.msra.mxu3 %v814_v31 }
 0x134   : > { %v525_v21 = vsel %vm524_vm15, %v1435_v9, %v521_v19  ;;  %878 = vmatpush.msrb.mxu2 %v806_v46  ;;  %vm1153_vm15 = vcmask 1042432  }
 0x135   : > { %v546_v22 = vmul.f32 %v525_v21, %v1680_v45  ;;  %v551_v45 = vmul.f32 %v1415_v23, %v547_v33 }
 0x136   : > { %1014 = vmatpush.msra.mxu2 %v990_v43 }
 0x137   : > { %v550_v29 = vmul.f32 %v1415_v23, %v546_v22  ;;  %v555_v36 = vadd.f32 %v1416_v28, %v551_v45 }
 0x139   : > { %v554_v30 = vadd.f32 %v1416_v28, %v550_v29 }
 0x13b   : > { %1324 = vmatmul.msk.f32.vlgmr.msra.gmra.mxu0 %vm475_vm0, %v554_v30 }
 0x143   : > { %1325 = vmatmul.msk.f32.gmra.mxu0 %vm475_vm0, %v555_v36 }
 0x14b   : > { %1326 = vmatmul.msk.f32.gmra.mxu0 %vm475_vm0, %v556_v39 }
 0x191   : > { %v583_v57 = vpop.xlane.xlu1 %582 }
 0x192   : > { %v588_v58 = vmul.f32 %v583_v57, %v1650_v20  ;;  %v615_v20 = vmul.f32 %v1437_v24, %v614_v61 }
 0x194   : > { %v591_v60 = vadd.f32 1e-05, %v588_v58  ;;  %v616_v7 = vmul.f32 0.5, %v615_v20 }
 0x196   : > { %1438 = vrsqrt.f32 %v591_v60  ;;  %v617_v10 = vsub.f32 1.5, %v616_v7  ;;  %vm609_vm5 = vweird.f32 %v591_v60 }
 0x198   : > { %v618_v13 = vmul.f32 %v1437_v24, %v617_v10 }
 0x19a   : > { %v622_v19 = vsel %vm621_vm10, %v1437_v24, %v618_v13 }
 0x19b   : > { %v625_v25 = vmul.f32 %v622_v19, %v1693_v54 }
 0x19c   : > { %v1439_v2 = vpop.eup %1438 }
 0x19d   : > { %v604_v8 = vmul.f32 %v1439_v2, %v591_v60  ;;  %vm610_vm6 = vweird.f32 %v1439_v2 }
 0x19e   : > { %vm611_vm9 = vmor %vm609_vm5, %vm610_vm6 }
 0x19f   : > { %v605_v9 = vmul.f32 %v1439_v2, %v604_v8 }
 0x1a1   : > { %v606_v11 = vmul.f32 0.5, %v605_v9 }
 0x1a3   : > { %v607_v32 = vsub.f32 1.5, %v606_v11 }
 0x1a5   : > { %v608_v14 = vmul.f32 %v1439_v2, %v607_v32 }
 0x1a6   : > { %v800_v15 = vpop.f32.mrf.mxu2 }
 0x1a7   : > { %v801_v16 = vadd.f32 %v1417_v12, %v800_v15  ;;  %v612_v17 = vsel %vm611_vm9, %v1439_v2, %v608_v14 }
 0x1a8   : > { %v624_v18 = vmul.f32 %v612_v17, %v1717_v27  ;;  %v629_v27 = vmul.f32 %v1743_v63, %v625_v25 }
 0x1a9   : > { %1334 = vmatmul.msk.f32.vlgmr.msrb.gmra.mxu2 %vm475_vm0, %v801_v16  ;;  %v829_v29 = vrot.slane %v801_v16, 1  ;;  %v920_v30 = vrot.slane %v801_v16, 3  ;;  %v953_v36 = vrot.slane %v801_v16, 4  ;;  %v887_v38 = vrot.slane %v801_v16, 2  ;;  %v708_v46 = vpop.f32.mrf.mxu1 }
 0x1aa   : > { %v628_v21 = vmul.f32 %v1743_v63, %v624_v18  ;;  %v633_v54 = vadd.f32 %v1750_v3, %v629_v27  ;;  %v709_v48 = vadd.f32 %v1418_v44, %v708_v46 }
 0x1ac   : > { %v632_v22 = vadd.f32 %v1750_v3, %v628_v21 }
 0x1ae   : > { %v803_v23 = vpop.f32.mrf.mxu3  ;;  %1328 = vmatmul.msk.f32.gmra.mxu1 %vm475_vm0, %v632_v22 }
 0x1af   : > { %v804_v26 = vadd.f32 %v1417_v12, %v803_v23 }
 0x1b1   : > { %v830_v28 = vrot.slane %v804_v26, 1  ;;  %v921_v33 = vrot.slane %v804_v26, 3  ;;  %1335 = vmatmul.msk.f32.gmra.mxu2 %vm475_vm0, %v804_v26  ;;  %v954_v35 = vrot.slane %v804_v26, 4  ;;  %v888_v37 = vrot.slane %v804_v26, 2 }
 0x1b3   : > { %v831_v34 = vsel %vm828_vm11, %v829_v29, %v830_v28  ;;  %v922_v45 = vsel %vm919_vm12, %v920_v30, %v921_v33  ;;  %v955_v63 = vsel %vm952_vm13, %v953_v36, %v954_v35  ;;  %v889_v39 = vsel %vm886_vm14, %v887_v38, %v888_v37 }
 0x1b4   : > { %1332 = vmatmul.msk.f32.vlgmr.msrb.gmra.mxu3 %vm475_vm0, %v831_v34  ;;  %1338 = vmatmul.msk.f32.vlgmr.msrb.gmra.mxu0 %vm475_vm0, %v922_v45 }
 0x1b6   : > { %1329 = vmatmul.msk.f32.gmra.mxu1 %vm475_vm0, %v633_v54  ;;  %v1420_v54 = vld [vmem:[%s1972_s10] ss:$0 sm:$0xff] }
 0x1b8   : > { %v665_v3 = vpop.f32.mrf.mxu0 }
 0x1b9   : > { %v666_v41 = vadd.f32 %v1419_v40, %v665_v3 }
 0x1bb   : > { %v674_v47 = vmax.f32 %v666_v41, 0.0 }
 0x1bc   : > { %1333 = vmatmul.msk.f32.gmra.mxu3 %vm475_vm0, %v830_v28  ;;  %1339 = vmatmul.msk.f32.gmra.mxu0 %vm475_vm0, %v921_v33 }
 0x1bd   : > { %v1867_v50 = vmul.f32 %v709_v48, %v674_v47  ;;  %v1421_v47 = vld [vmem:[%s1972_s10 + $0x1] ss:$0 sm:$0xff] }
 0x1be   : > { %1340 = vmatmul.msk.f32.vlgmr.msrb.gmra.mxu1 %vm475_vm0, %v955_v63 }
 0x1bf   : > { %v1154_v56 = vrot.slane %v1867_v50, 5  ;;  %v1174_v57 = vrot.slane %v1867_v50, 6  ;;  %v1084_v24 = vrot.slane %v1867_v50, 1  ;;  %v1101_v59 = vrot.slane %v1867_v50, 2 }
 0x1c0   : > { %v668_v42 = vpop.f32.mrf.mxu0  ;;  %v1118_v60 = vrot.slane %v1867_v50, 3  ;;  %v1194_v61 = vrot.slane %v1867_v50, 7  ;;  %v1135_v7 = vrot.slane %v1867_v50, 4 }
 0x1c1   : > { %v669_v49 = vadd.f32 %v1419_v40, %v668_v42 }
 0x1c3   : > { %v675_v52 = vmax.f32 %v669_v49, 0.0 }
 0x1c4   : > { %1336 = vmatmul.msk.f32.vlgmr.msra.gmra.mxu3 %vm475_vm0, %v889_v39 }
 0x1c6   : > { %1341 = vmatmul.msk.f32.gmra.mxu1 %vm475_vm0, %v954_v35 }
 0x1c8   : > { %v671_v53 = vpop.f32.mrf.mxu0 }
 0x1c9   : > { %v672_v62 = vadd.f32 %v1419_v40, %v671_v53 }
 0x1cb   : > { %v676_v14 = vmax.f32 %v672_v62, 0.0 }
 0x1cc   : > { %1337 = vmatmul.msk.f32.gmra.mxu3 %vm475_vm0, %v888_v37 }
 0x22b   : > { %v711_v51 = vpop.f32.mrf.mxu1 }
 0x22c   : > { %v712_v55 = vadd.f32 %v1418_v44, %v711_v51  ;;  %v880_v29 = vpop.f32.mrf.mxu2  ;;  %v1529_v51 = vmov 5  }
 0x22d   : > { %1400 = vset.pattern.permute.xlu2 %v1529_v51 }
 0x22e   : > { %v1872_v58 = vmul.f32 %v712_v55, %v675_v52  ;;  %v1530_v52 = vmov 1   ;;  %v1531_v55 = vmov 0  }
 0x22f   : > { %1396 = vset.pattern.permute.xlu0 %v1530_v52  ;;  %1395 = vset.pattern.permute.xlu1 %v1531_v55 }
 0x230   : > { %v1155_v0 = vrot.slane %v1872_v58, 5  ;;  %v1175_v20 = vrot.slane %v1872_v58, 6  ;;  %v1085_v1 = vrot.slane %v1872_v58, 1  ;;  %v1102_v2 = vrot.slane %v1872_v58, 2 }
 0x231   : > { %v1136_v4 = vrot.slane %v1872_v58, 4  ;;  %v1119_v5 = vrot.slane %v1872_v58, 3  ;;  %v1195_v6 = vrot.slane %v1872_v58, 7  ;;  %v944_v30 = vpop.f32.mrf.mxu0 }
 0x232   : > { %v1886_v8 = vsel %vm1153_vm15, %v1154_v56, %v1155_v0  ;;  %v1889_v9 = vsel %vm1173_vm1, %v1174_v57, %v1175_v20  ;;  %v1894_v10 = vsel %vm828_vm11, %v1084_v24, %v1085_v1  ;;  %v1899_v11 = vsel %vm886_vm14, %v1101_v59, %v1102_v2 }
 0x233   : > { %v714_v12 = vpop.f32.mrf.mxu1  ;;  %v1904_v31 = vsel %vm919_vm12, %v1118_v60, %v1119_v5  ;;  %v1907_v32 = vsel %vm1193_vm2, %v1194_v61, %v1195_v6  ;;  %v1912_v13 = vsel %vm952_vm13, %v1135_v7, %v1136_v4  ;;  %vm1206_vm12 = vcmask 257024  }
 0x234   : > { %v715_v15 = vadd.f32 %v1418_v44, %v714_v12  ;;  %v883_v36 = vpop.f32.mrf.mxu2 }
 0x236   : > { %v719_v17 = vmul.f32 %v715_v15, %v676_v14 }
 0x237   : > { %v853_v16 = vpop.f32.mrf.mxu3 }
 0x238   : > { %v1197_v18 = vrot.slane %v719_v17, 7  ;;  %v1157_v19 = vrot.slane %v719_v17, 5  ;;  %v1177_v21 = vrot.slane %v719_v17, 6  ;;  %v881_v28 = vadd.f32 %v880_v29, %v853_v16 }
 0x239   : > { %v947_v40 = vpop.f32.mrf.mxu0 }
 0x23a   : > { %v1915_v22 = vsel %vm1193_vm2, %v1195_v6, %v1197_v18  ;;  %v1918_v23 = vsel %vm1153_vm15, %v1155_v0, %v1157_v19  ;;  %v1921_v25 = vsel %vm1173_vm1, %v1175_v20, %v1177_v21 }
 0x23b   : > { %v977_v34 = vpop.f32.mrf.mxu1 }
 0x23f   : > { %v856_v26 = vpop.f32.mrf.mxu3 }
 0x240   : > { %v884_v63 = vadd.f32 %v883_v36, %v856_v26  ;;  %v1532_v36 = vmov 6  }
 0x243   : > { %v980_v41 = vpop.f32.mrf.mxu1 }
 0x247   : > { %v911_v33 = vpop.f32.mrf.mxu3 }
 0x248   : > { %v917_v27 = vadd.f32 %v911_v33, %v881_v28 }
 0x24a   : > { %v950_v45 = vadd.f32 %v944_v30, %v917_v27 }
 0x24c   : > { %v983_v35 = vadd.f32 %v977_v34, %v950_v45 }
 0x24e   : > { %v986_v37 = vadd.f32 %v1420_v54, %v983_v35 }
 0x24f   : > { %v914_v38 = vpop.f32.mrf.mxu3 }
 0x250   : > { %v988_v39 = vmax.f32 %v986_v37, 0.0  ;;  %v918_v3 = vadd.f32 %v914_v38, %v884_v63  ;;  %v1533_v63 = vmov 4   ;;  %v1534_v37 = vmov 2  }
 0x251   : > { %v1535_v38 = vmov 3  }
 0x252   : > { %v951_v43 = vadd.f32 %v947_v40, %v918_v3  ;;  %1342 = vmatmul.msk.f32.vlgmr.msra.gmra.mxu2 %vm992_vm3, %v988_v39  ;;  %v1536_v39 = vmov 7  }
 0x254   : > { %v984_v42 = vadd.f32 %v980_v41, %v951_v43 }
 0x256   : > { %v987_v44 = vadd.f32 %v1420_v54, %v984_v42 }
 0x258   : > { %v989_v46 = vmax.f32 %v987_v44, 0.0 }
 0x25a   : > { %1343 = vmatmul.msk.f32.gmra.mxu2 %vm992_vm3, %v989_v46 }
 0x2d5   : > { %v1016_v48 = vpop.f32.mrf.mxu2 }
 0x2d6   : > { %v1017_v49 = vadd.f32 %v1421_v47, %v1016_v48 }
 0x2d8   : > { %v1344_v53 = vmul.f32 -1.442695, %v1017_v49 }
 0x2da   : > { %1440 = vpow2.f32 %v1344_v53 }
 0x2dd   : > { %v1019_v56 = vpop.f32.mrf.mxu2 }
 0x2de   : > { %v1020_v57 = vadd.f32 %v1421_v47, %v1019_v56 }
 0x2e0   : > { %v1441_v24 = vpop.eup %1440  ;;  %v1345_v59 = vmul.f32 -1.442695, %v1020_v57 }
 0x2e1   : > { %v1028_v60 = vadd.f32 1.0, %v1441_v24 }
 0x2e2   : > { %1442 = vpow2.f32 %v1345_v59 }
 0x2e3   : > { %1444 = vrcp.f32 %v1028_v60  ;;  %v1041_v7 = vand.u32 2147483648, %v1028_v60  ;;  %v1039_v14 = vand.u32 2147483647, %v1028_v60  ;;  %vm1035_vm5 = vweird.f32 %v1028_v60 }
 0x2e5   : > { %v1042_v17 = vor.u32 1.1754944e-38, %v1041_v7  ;;  %vm1040_vm7 = vcmp.eq.f32.partialorder %v1039_v14, 8.507059e+37 }
 0x2e8   : > { %v1443_v61 = vpop.eup %1442 }
 0x2e9   : > { %v1445_v62 = vpop.eup %1444  ;;  %v1029_v0 = vadd.f32 1.0, %v1443_v61 }
 0x2ea   : > { %v1031_v20 = vmul.f32 %v1445_v62, %v1028_v60  ;;  %vm1036_vm4 = vweird.f32 %v1445_v62 }
 0x2eb   : > { %1446 = vrcp.f32 %v1029_v0  ;;  %vm1037_vm6 = vmor %vm1035_vm5, %vm1036_vm4  ;;  %v1056_v28 = vand.u32 2147483648, %v1029_v0  ;;  %v1054_v33 = vand.u32 2147483647, %v1029_v0  ;;  %vm1050_vm9 = vweird.f32 %v1029_v0 }
 0x2ec   : > { %v1032_v6 = vsub.f32 1.0, %v1031_v20 }
 0x2ed   : > { %v1057_v34 = vor.u32 1.1754944e-38, %v1056_v28  ;;  %vm1055_vm11 = vcmp.eq.f32.partialorder %v1054_v33, 8.507059e+37 }
 0x2ee   : > { %v1033_v12 = vmul.f32 %v1445_v62, %v1032_v6 }
 0x2f0   : > { %v1034_v15 = vadd.f32 %v1445_v62, %v1033_v12 }
 0x2f1   : > { %v1447_v16 = vpop.eup %1446 }
 0x2f2   : > { %v1038_v18 = vsel %vm1037_vm6, %v1445_v62, %v1034_v15  ;;  %v1046_v19 = vmul.f32 %v1447_v16, %v1029_v0  ;;  %vm1051_vm8 = vweird.f32 %v1447_v16 }
 0x2f3   : > { %v1043_v21 = vsel %vm1040_vm7, %v1042_v17, %v1038_v18  ;;  %vm1052_vm10 = vmor %vm1050_vm9, %vm1051_vm8 }
 0x2f4   : > { %v1060_v26 = vmul.f32 0.125, %v1043_v21  ;;  %v1047_v29 = vsub.f32 1.0, %v1046_v19 }
 0x2f6   : > { %v1048_v30 = vmul.f32 %v1447_v16, %v1047_v29  ;;  %1145 = vperm.xlu2 %1400, %v1060_v26   ;;  %1075 = vperm.xlu0 %1396, %v1060_v26  }
 0x2f7   : > { %1064 = vperm.xlu1 %1395, %v1060_v26  }
 0x2f8   : > { %v1049_v27 = vadd.f32 %v1447_v16, %v1048_v30 }
 0x2fa   : > { %v1053_v45 = vsel %vm1052_vm10, %v1447_v16, %v1049_v27 }
 0x2fb   : > { %v1058_v54 = vsel %vm1055_vm11, %v1057_v34, %v1053_v45 }
 0x2fc   : > { %v1061_v35 = vmul.f32 0.125, %v1058_v54 }
 0x2fe   : > { %1401 = vset.pattern.permute.xlu2 %v1532_v36  ;;  %1406 = vset.pattern.permute.xlu0 %v1533_v63 }
 0x2ff   : > { %1397 = vset.pattern.permute.xlu1 %v1534_v37  ;;  %1166 = vperm.xlu2 %1401, %v1060_v26  }
 0x300   : > { %1094 = vperm.xlu1 %1397, %v1060_v26   ;;  %1132 = vperm.xlu0 %1406, %v1061_v35  }
 0x307   : > { %1402 = vset.pattern.permute.xlu2 %v1531_v55 }
 0x308   : > { %1398 = vset.pattern.permute.xlu1 %v1535_v38  ;;  %1409 = vset.pattern.permute.xlu0 %v1536_v39 }
 0x309   : > { %1111 = vperm.xlu1 %1398, %v1060_v26   ;;  %1186 = vperm.xlu0 %1409, %v1060_v26  }
 0x30a   : > { %1069 = vperm.xlu2 %1402, %v1061_v35  }
 0x311   : > { %1399 = vset.pattern.permute.xlu1 %v1533_v63 }
 0x312   : > { %1403 = vset.pattern.permute.xlu2 %v1530_v52  ;;  %1128 = vperm.xlu1 %1399, %v1060_v26  }
 0x313   : > { %1079 = vperm.xlu2 %1403, %v1061_v35  }
 0x31a   : > { %1407 = vset.pattern.permute.xlu1 %v1529_v51 }
 0x31b   : > { %1404 = vset.pattern.permute.xlu2 %v1534_v37  ;;  %1149 = vperm.xlu1 %1407, %v1061_v35  }
 0x31c   : > { %1098 = vperm.xlu2 %1404, %v1061_v35  }
 0x323   : > { %1408 = vset.pattern.permute.xlu1 %v1532_v36 }
 0x324   : > { %1405 = vset.pattern.permute.xlu2 %v1535_v38  ;;  %1170 = vperm.xlu1 %1408, %v1061_v35  }
 0x325   : > { %1115 = vperm.xlu2 %1405, %v1061_v35  }
 0x32d   : > { %1410 = vset.pattern.permute.xlu2 %v1536_v39 }
 0x32e   : > { %1190 = vperm.xlu2 %1410, %v1061_v35  }
 0x350   : > { %v1146_v3 = vpop.permute.xlu2 %1145 }
 0x359   : > { %v1167_v40 = vpop.permute.xlu2 %1166 }
 0x364   : > { %v1070_v43 = vpop.permute.xlu2 %1069 }
 0x368   : > { %v1076_v41 = vpop.permute.xlu0 %1075 }
 0x369   : > { %v1089_v42 = vmul.f32 %v1894_v10, %v1076_v41  ;;  %v1065_v44 = vpop.permute.xlu1 %1064  ;;  %v1073_v10 = vmul.f32 %v1070_v43, %v1872_v58 }
 0x36a   : > { %v1072_v46 = vmul.f32 %v1065_v44, %v1867_v50 }
 0x36c   : > { %v1091_v47 = vadd.f32 %v1089_v42, %v1072_v46 }
 0x36d   : > { %v1080_v48 = vpop.permute.xlu2 %1079 }
 0x36e   : > { %v1090_v59 = vmul.f32 %v1085_v1, %v1080_v48  ;;  %v1181_v1 = vmul.f32 %v1889_v9, %v1167_v40 }
 0x370   : > { %v1092_v62 = vadd.f32 %v1090_v59, %v1073_v10 }
 0x372   : > { %v1095_v49 = vpop.permute.xlu1 %1094  ;;  %v1133_v57 = vpop.permute.xlu0 %1132 }
 0x373   : > { %v1106_v51 = vmul.f32 %v1899_v11, %v1095_v49 }
 0x375   : > { %v1108_v52 = vadd.f32 %v1106_v51, %v1091_v47 }
 0x376   : > { %v1099_v53 = vpop.permute.xlu2 %1098 }
 0x377   : > { %v1107_v50 = vmul.f32 %v1102_v2, %v1099_v53  ;;  %v1141_v2 = vmul.f32 %v1136_v4, %v1133_v57 }
 0x379   : > { %v1109_v6 = vadd.f32 %v1107_v50, %v1092_v62 }
 0x37b   : > { %v1112_v55 = vpop.permute.xlu1 %1111  ;;  %v1187_v7 = vpop.permute.xlu0 %1186 }
 0x37c   : > { %v1123_v56 = vmul.f32 %v1904_v31, %v1112_v55  ;;  %v1161_v31 = vmul.f32 %v1886_v8, %v1146_v3  ;;  %v1201_v15 = vmul.f32 %v1907_v32, %v1187_v7 }
 0x37e   : > { %v1125_v24 = vadd.f32 %v1123_v56, %v1108_v52 }
 0x37f   : > { %v1116_v60 = vpop.permute.xlu2 %1115 }
 0x380   : > { %v1124_v0 = vmul.f32 %v1119_v5, %v1116_v60 }
 0x382   : > { %v1126_v14 = vadd.f32 %v1124_v0, %v1109_v6 }
 0x384   : > { %v1129_v61 = vpop.permute.xlu1 %1128 }
 0x385   : > { %v1140_v11 = vmul.f32 %v1912_v13, %v1129_v61  ;;  %v1143_v13 = vadd.f32 %v1141_v2, %v1126_v14 }
 0x387   : > { %v1142_v20 = vadd.f32 %v1140_v11, %v1125_v24 }
 0x388   : > { %v1191_v18 = vpop.permute.xlu2 %1190 }
 0x389   : > { %v1163_v12 = vadd.f32 %v1161_v31, %v1142_v20  ;;  %v1202_v21 = vmul.f32 %v1915_v22, %v1191_v18 }
 0x38b   : > { %v1183_v16 = vadd.f32 %v1181_v1, %v1163_v12 }
 0x38d   : > { %v1203_v5 = vadd.f32 %v1201_v15, %v1183_v16  ;;  %v1150_v8 = vpop.permute.xlu1 %1149 }
 0x38e   : > { %v1162_v17 = vmul.f32 %v1918_v23, %v1150_v8 }
 0x38f   : > { %1205 = vst.msk [vmem:[%s460_s19] sm:$0xff] %vm475_vm0, %v1203_v5 }
 0x390   : > { %v1164_v9 = vadd.f32 %v1162_v17, %v1143_v13 }
 0x396   : > { %v1171_v19 = vpop.permute.xlu1 %1170 }
 0x397   : > { %v1182_v32 = vmul.f32 %v1921_v25, %v1171_v19 }
 0x399   : > { %v1184_v26 = vadd.f32 %v1182_v32, %v1164_v9 }
 0x39b   : > { %v1204_v29 = vadd.f32 %v1202_v21, %v1184_v26 }
 0x39d   : > { %1207 = vst.msk [vmem:[%s460_s19 + $0x8] sm:$0xf] %vm1206_vm12, %v1204_v29 }
 0x39e PF: > { %s23_s17 = sadd.s32 1, %s1522_s17  }
 0x39f   : > { %p20_p7 = scmp.ge.s32.totalorder %s23_s17, 4  }
 0x3a1   :  { %22 = sbr.rel (!%p20_p7) target bundleno = 2 (0x2), region = 109 }
 0x3a6   :  { %1229 = vsyncpa [#allocation3], 1 }
 0x3a7   :  { %1231 = vsyncpa [#allocation3 + $0x1], 1 }
 0x3a8   :  { %1232 = vsyncpa [#allocation5], 1 }

</bundles_post_ra>
